<compile_context>
chip_gen: v5e
topology: v5e:2x2
jax: 0.10.0
libtpu: 0.0.40
codegen_flags: <defaults>
</compile_context>

<pallas_src>
import functools

import jax
import jax.numpy as jnp
from jax import lax
from jax.experimental import pallas as pl
from jax.experimental.pallas import tpu as pltpu


def _round_up(x: int, m: int) -> int:
    return ((x + m - 1) // m) * m


def _coupling_kernel(z_ref, g_ref, w1z_ref, w1g_ref, b1_ref,
                     w2s_ref, w2t_ref, b2s_ref, b2t_ref,
                     y_ref, ld_ref, *, reverse: bool):
    # z_ref : (TB, D)        g_ref : (TB, C)
    # w1z   : (D, H)  zero rows where z2 would be   w1g : (C, H)    b1 : (1, H)
    # w2s/w2t : (H, D) zero cols on the pass-through half; b2s/b2t : (1, D) likewise
    # y_ref : (TB, D)        ld_ref: (1, TB)  lane-dense log-det row

    # Linear 1 + ReLU:  a = relu([z1 | g] @ w1 + b1) as two MXU dots accumulating
    # in f32 -- the [z1, g] concat never materializes and z is never lane-sliced
    # (the z2 rows of w1z are exactly zero).
    a = (jnp.dot(z_ref[...], w1z_ref[...], preferred_element_type=jnp.float32)
         + jnp.dot(g_ref[...], w1g_ref[...], preferred_element_type=jnp.float32)
         + b1_ref[...])
    a = jnp.maximum(a, 0.0)
    a_in = a.astype(w2s_ref.dtype)          # bf16 feed for the 2nd MXU pass (no-op in f32)

    # Linear 2 with zero-padded full-width s / t heads: columns [0, D//2) are
    # exactly zero, so tanh/exp turn them into the identity on the pass-through
    # half and the affine below needs no slicing or masked stores.
    s = jnp.tanh(jnp.dot(a_in, w2s_ref[...], preferred_element_type=jnp.float32)
                 + b2s_ref[...])
    t = jnp.dot(a_in, w2t_ref[...], preferred_element_type=jnp.float32) + b2t_ref[...]

    zf = z_ref[...].astype(jnp.float32)
    if not reverse:
        y = zf * jnp.exp(s) + t             # exp/tanh land on the EUP slot
    else:
        y = (zf - t) * jnp.exp(-s)
    y_ref[...] = y.astype(y_ref.dtype)      # ONE lane-uniform full-width store

    # log-det: per-row sum of s landed lane-dense as a (1, TB) row via an MXU dot
    # that contracts s's last axis directly (no explicit s.T / XLU transpose).
    ones_row = jnp.ones((1, s.shape[-1]), dtype=jnp.float32)
    ld = lax.dot_general(ones_row, s,
                         dimension_numbers=(((1,), (1,)), ((), ())),
                         preferred_element_type=jnp.float32)
    ld_ref[...] = -ld if reverse else ld


def affine_coupling_forward(z, g, params, *, reverse: bool = False,
                            batch_tile: int = 1024,
                            input_dtype=jnp.float32):
    """Pallas implementation of _AffineCoupling.forward.

    Args:
      z: (B, D) float32 latent.
      g: (B, C) float32 goal conditioning.
      params: dict with w1 (D//2+C, H), b1 (H,), w2 (H, D), b2 (D,).
      reverse: inverse mapping if True.
      batch_tile: max rows per grid step (single step whenever B <= batch_tile).
      input_dtype: dtype of the streamed z/g/weight tensors (f32 or bf16); all
        math and outputs stay f32.
    Returns:
      y        : (B, D) float32
      log_det  : (B,)   float32
    """
    B, D = z.shape
    C = g.shape[-1]
    assert D % 2 == 0, "latent dim must be even for a half-split coupling"
    half = D // 2
    w1, b1, w2, b2 = params["w1"], params["b1"], params["w2"], params["b2"]
    H = w1.shape[-1]
    assert w1.shape[0] == half + C and w2.shape == (H, D)

    dt = jnp.dtype(input_dtype)

    # ---- host-side weight prep (cheap, fused by XLA): zero-pad to full width D
    # so the kernel never slices activations or does masked half-row stores. ----
    w1z = jnp.zeros((D, H), dt).at[:half, :].set(w1[:half].astype(dt))      # z rows (z2 rows = 0)
    w1g = w1[half:].astype(dt)                                              # g rows
    b1r = b1.reshape(1, H).astype(jnp.float32)
    w2s = jnp.zeros((H, D), dt).at[:, half:].set(w2[:, :half].astype(dt))   # s-head -> cols [half:)
    w2t = jnp.zeros((H, D), dt).at[:, half:].set(w2[:, half:].astype(dt))   # t-head -> cols [half:)
    b2s = jnp.zeros((1, D), jnp.float32).at[0, half:].set(b2[:half].astype(jnp.float32))
    b2t = jnp.zeros((1, D), jnp.float32).at[0, half:].set(b2[half:].astype(jnp.float32))
    zc = z.astype(dt)
    gc = g.astype(dt)

    # ---- batch tiling: one grid step when it fits, otherwise equal 128-multiple
    # blocks (balanced across v7x's two TCs; lane-aligned (1, tb) log-det blocks). ----
    if B <= batch_tile:
        tb = B
    else:
        nsteps = pl.cdiv(B, batch_tile)
        tb = _round_up(pl.cdiv(B, nsteps), 128)
    grid = (pl.cdiv(B, tb),)

    kernel = functools.partial(_coupling_kernel, reverse=reverse)

    # Advisory cost estimate (padded dims).
    flops = 2 * B * H * (3 * D + C)
    transcendentals = 2 * B * D                       # tanh + exp over full width
    bytes_accessed = (dt.itemsize * (B * (D + C) + (D + C) * H + 2 * H * D)
                      + 4 * (B * D + B + H + 2 * D))
    cost = pl.CostEstimate(flops=flops, transcendentals=transcendentals,
                           bytes_accessed=bytes_accessed)

    # Explicit VMEM budget: double-buffered z/g/y/log-det tiles + resident weights,
    # with generous headroom; keep well under v7x's 64 MiB physical VMEM.
    est_vmem = (2 * tb * (D + C) * dt.itemsize          # double-buffered z, g tiles
                + 2 * (tb * D + tb) * 4                  # double-buffered y, log-det tiles
                + 2 * ((D + C) * H + 2 * H * D) * dt.itemsize + (H + 2 * D) * 4)
    vmem_limit = int(min(max(2 * est_vmem, 16 * 1024 * 1024), 48 * 1024 * 1024))

    y, ld = pl.pallas_call(
        kernel,
        out_shape=(
            jax.ShapeDtypeStruct((B, D), jnp.float32),
            jax.ShapeDtypeStruct((1, B), jnp.float32),   # lane-dense log-det row
        ),
        grid_spec=pltpu.PrefetchScalarGridSpec(
            num_scalar_prefetch=0,
            grid=grid,
            in_specs=[
                pl.BlockSpec((tb, D), lambda i: (i, 0)),   # z
                pl.BlockSpec((tb, C), lambda i: (i, 0)),   # g
                pl.BlockSpec((D, H),  lambda i: (0, 0)),   # w1 (z rows, zero-padded)
                pl.BlockSpec((C, H),  lambda i: (0, 0)),   # w1 (g rows)
                pl.BlockSpec((1, H),  lambda i: (0, 0)),   # b1
                pl.BlockSpec((H, D),  lambda i: (0, 0)),   # w2 s-head (full width, padded)
                pl.BlockSpec((H, D),  lambda i: (0, 0)),   # w2 t-head (full width, padded)
                pl.BlockSpec((1, D),  lambda i: (0, 0)),   # b2 s-head (padded)
                pl.BlockSpec((1, D),  lambda i: (0, 0)),   # b2 t-head (padded)
            ],
            out_specs=(
                pl.BlockSpec((tb, D), lambda i: (i, 0)),   # y (full width)
                pl.BlockSpec((1, tb), lambda i: (0, i)),   # log_det (lane-dense)
            ),
        ),
        compiler_params=pltpu.CompilerParams(
            dimension_semantics=("parallel",),
            vmem_limit_bytes=vmem_limit),
        cost_estimate=cost,
    )(zc, gc, w1z, w1g, b1r, w2s, w2t, b2s, b2t)

    return y, ld[0]


def init_params(key, dim: int, cond_dim: int, hidden: int = 32):
    """Deterministic synthetic parameters (same shapes as the nn.Linear layers,
    stored transposed relative to torch's (out, in) convention)."""
    half = dim // 2
    in_dim = half + cond_dim
    k1, k2, k3, k4 = jax.random.split(key, 4)
    w1 = jax.random.normal(k1, (in_dim, hidden), jnp.float32) * (1.0 / jnp.sqrt(in_dim))
    b1 = jax.random.normal(k2, (hidden,), jnp.float32) * 0.01
    w2 = jax.random.normal(k3, (hidden, half * 2), jnp.float32) * (1.0 / jnp.sqrt(hidden))
    b2 = jax.random.normal(k4, (half * 2,), jnp.float32) * 0.01
    return {"w1": w1, "b1": b1, "w2": w2, "b2": b2}


def _reference(z, g, params, reverse=False):
    half = z.shape[-1] // 2
    z1, z2 = z[:, :half], z[:, half:]
    h = jnp.concatenate([z1, g], axis=-1)
    a = jnp.maximum(h @ params["w1"] + params["b1"], 0.0)
    st = a @ params["w2"] + params["b2"]
    s = jnp.tanh(st[:, :half])
    t = st[:, half:]
    if not reverse:
        y2 = z2 * jnp.exp(s) + t
        ld = s.sum(-1)
    else:
        y2 = (z2 - t) * jnp.exp(-s)
        ld = -s.sum(-1)
    return jnp.concatenate([z1, y2], axis=-1), ld


if __name__ == "__main__":
    B, D, C, H = 8, 16, 8, 32

    key = jax.random.PRNGKey(0)
    kz, kg, kp, kz2, kg2 = jax.random.split(key, 5)
    z = jax.random.normal(kz, (B, D), jnp.float32)
    g = jax.random.normal(kg, (B, C), jnp.float32)
    params = init_params(kp, D, C, H)

    # forward
    y, log_det = affine_coupling_forward(z, g, params, reverse=False)
    jax.block_until_ready((y, log_det))
    y_ref, ld_ref = _reference(z, g, params, reverse=False)
    assert y.shape == (B, D) and log_det.shape == (B,)
    assert jnp.allclose(y, y_ref, atol=1e-4, rtol=1e-4)
    assert jnp.allclose(log_det, ld_ref, atol=1e-4, rtol=1e-4)

    # reverse (inverse) path, round-trip check
    z_back, ld_inv = affine_coupling_forward(y, g, params, reverse=True)
    jax.block_until_ready((z_back, ld_inv))
    assert jnp.allclose(z_back, z, atol=1e-4, rtol=1e-4)
    assert jnp.allclose(ld_inv, -ld_ref, atol=1e-4, rtol=1e-4)

    # larger batch: single grid step (whole batch in one tile), lane-dense (1, 384) log-det
    B2 = 384
    z_big = jax.random.normal(kz2, (B2, D), jnp.float32)
    g_big = jax.random.normal(kg2, (B2, C), jnp.float32)
    y_big, ld_big = affine_coupling_forward(z_big, g_big, params)
    jax.block_until_ready((y_big, ld_big))
    y_big_ref, ld_big_ref = _reference(z_big, g_big, params)
    assert jnp.allclose(y_big, y_big_ref, atol=1e-4, rtol=1e-4)
    assert jnp.allclose(ld_big, ld_big_ref, atol=1e-4, rtol=1e-4)

    # multi-step grid: 640 rows with batch_tile=256 -> balanced 256-row blocks
    # (3 steps, partial final block) exercising the tiled path.
    B3 = 640
    z3 = jax.random.normal(jax.random.PRNGKey(3), (B3, D), jnp.float32)
    g3 = jax.random.normal(jax.random.PRNGKey(4), (B3, C), jnp.float32)
    y3, ld3 = affine_coupling_forward(z3, g3, params, batch_tile=256)
    jax.block_until_ready((y3, ld3))
    y3_ref, ld3_ref = _reference(z3, g3, params)
    assert jnp.allclose(y3, y3_ref, atol=1e-4, rtol=1e-4)
    assert jnp.allclose(ld3, ld3_ref, atol=1e-4, rtol=1e-4)

    # bf16 streaming path (halves the dominant HBM traffic); compare against a
    # reference evaluated on the same bf16-rounded inputs/weights in f32.
    y_bf, ld_bf = affine_coupling_forward(z_big, g_big, params,
                                          input_dtype=jnp.bfloat16)
    jax.block_until_ready((y_bf, ld_bf))
    z_bfr = z_big.astype(jnp.bfloat16).astype(jnp.float32)
    g_bfr = g_big.astype(jnp.bfloat16).astype(jnp.float32)
    params_bfr = jax.tree_util.tree_map(
        lambda p: p.astype(jnp.bfloat16).astype(jnp.float32), params)
    y_bf_ref, ld_bf_ref = _reference(z_bfr, g_bfr, params_bfr)
    assert jnp.allclose(y_bf, y_bf_ref, atol=2e-2, rtol=2e-2)
    assert jnp.allclose(ld_bf, ld_bf_ref, atol=2e-2, rtol=2e-2)

    print("KERNEL_OK")
</pallas_src>

<mosaic_0001>
module attributes {stable_mosaic.version = 11 : i64} {
  func.func @_coupling_kernel(%arg0: i32, %arg1: memref<8x16xf32, #tpu.memory_space<vmem>>, %arg2: memref<8x8xf32, #tpu.memory_space<vmem>>, %arg3: memref<16x32xf32, #tpu.memory_space<vmem>>, %arg4: memref<8x32xf32, #tpu.memory_space<vmem>>, %arg5: memref<1x32xf32, #tpu.memory_space<vmem>>, %arg6: memref<32x16xf32, #tpu.memory_space<vmem>>, %arg7: memref<32x16xf32, #tpu.memory_space<vmem>>, %arg8: memref<1x16xf32, #tpu.memory_space<vmem>>, %arg9: memref<1x16xf32, #tpu.memory_space<vmem>>, %arg10: memref<8x16xf32, #tpu.memory_space<vmem>>, %arg11: memref<1x8xf32, #tpu.memory_space<vmem>>) attributes {dimension_semantics = [#tpu.dimension_semantics<parallel>], iteration_bounds = array<i64: 1>, scalar_prefetch = 0 : i64, scratch_operands = 0 : i64, tpu.core_type = #tpu.core_type<tc>, window_params = [{transform_indices = @transform_0, window_bounds = array<i64: 8, 16>}, {transform_indices = @transform_1, window_bounds = array<i64: 8, 8>}, {pipeline_mode = #tpu.pipeline_mode<synchronous>, transform_indices = @transform_2, window_bounds = array<i64: 16, 32>}, {pipeline_mode = #tpu.pipeline_mode<synchronous>, transform_indices = @transform_3, window_bounds = array<i64: 8, 32>}, {pipeline_mode = #tpu.pipeline_mode<synchronous>, transform_indices = @transform_4, window_bounds = array<i64: 1, 32>}, {pipeline_mode = #tpu.pipeline_mode<synchronous>, transform_indices = @transform_5, window_bounds = array<i64: 32, 16>}, {pipeline_mode = #tpu.pipeline_mode<synchronous>, transform_indices = @transform_6, window_bounds = array<i64: 32, 16>}, {pipeline_mode = #tpu.pipeline_mode<synchronous>, transform_indices = @transform_7, window_bounds = array<i64: 1, 16>}, {pipeline_mode = #tpu.pipeline_mode<synchronous>, transform_indices = @transform_8, window_bounds = array<i64: 1, 16>}, {transform_indices = @transform_9, window_bounds = array<i64: 8, 16>}, {transform_indices = @transform_10, window_bounds = array<i64: 1, 8>}]} {
    %c0 = arith.constant 0 : index
    %c0_0 = arith.constant 0 : index
    %0 = vector.load %arg1[%c0, %c0_0] : memref<8x16xf32, #tpu.memory_space<vmem>>, vector<8x16xf32>
    %c0_1 = arith.constant 0 : index
    %c0_2 = arith.constant 0 : index
    %1 = vector.load %arg3[%c0_1, %c0_2] : memref<16x32xf32, #tpu.memory_space<vmem>>, vector<16x32xf32>
    %cst = arith.constant dense<0.000000e+00> : vector<8x32xf32>
    %2 = tpu.matmul %0, %1, %cst {dimension_numbers = #tpu.dot_dimension_numbers<[1], [0], [0], [1], [0, 0, 1, 1], [], []>} : vector<8x16xf32>, vector<16x32xf32>, vector<8x32xf32> -> vector<8x32xf32>
    %c0_3 = arith.constant 0 : index
    %c0_4 = arith.constant 0 : index
    %3 = vector.load %arg2[%c0_3, %c0_4] : memref<8x8xf32, #tpu.memory_space<vmem>>, vector<8x8xf32>
    %c0_5 = arith.constant 0 : index
    %c0_6 = arith.constant 0 : index
    %4 = vector.load %arg4[%c0_5, %c0_6] : memref<8x32xf32, #tpu.memory_space<vmem>>, vector<8x32xf32>
    %cst_7 = arith.constant dense<0.000000e+00> : vector<8x32xf32>
    %5 = tpu.matmul %3, %4, %cst_7 {dimension_numbers = #tpu.dot_dimension_numbers<[1], [0], [0], [1], [0, 0, 1, 1], [], []>} : vector<8x8xf32>, vector<8x32xf32>, vector<8x32xf32> -> vector<8x32xf32>
    %6 = arith.addf %2, %5 : vector<8x32xf32>
    %c0_8 = arith.constant 0 : index
    %c0_9 = arith.constant 0 : index
    %7 = vector.load %arg5[%c0_8, %c0_9] : memref<1x32xf32, #tpu.memory_space<vmem>>, vector<1x32xf32>
    %8 = vector.broadcast %7 : vector<1x32xf32> to vector<8x32xf32>
    %9 = arith.addf %6, %8 : vector<8x32xf32>
    %cst_10 = arith.constant 0.000000e+00 : f32
    %10 = vector.broadcast %cst_10 : f32 to vector<8x32xf32>
    %11 = arith.maximumf %9, %10 : vector<8x32xf32>
    %c0_11 = arith.constant 0 : index
    %c0_12 = arith.constant 0 : index
    %12 = vector.load %arg6[%c0_11, %c0_12] : memref<32x16xf32, #tpu.memory_space<vmem>>, vector<32x16xf32>
    %cst_13 = arith.constant dense<0.000000e+00> : vector<8x16xf32>
    %13 = tpu.matmul %11, %12, %cst_13 {dimension_numbers = #tpu.dot_dimension_numbers<[1], [0], [0], [1], [0, 0, 1, 1], [], []>} : vector<8x32xf32>, vector<32x16xf32>, vector<8x16xf32> -> vector<8x16xf32>
    %c0_14 = arith.constant 0 : index
    %c0_15 = arith.constant 0 : index
    %14 = vector.load %arg8[%c0_14, %c0_15] : memref<1x16xf32, #tpu.memory_space<vmem>>, vector<1x16xf32>
    %15 = vector.broadcast %14 : vector<1x16xf32> to vector<8x16xf32>
    %16 = arith.addf %13, %15 : vector<8x16xf32>
    %17 = math.tanh %16 : vector<8x16xf32>
    %c0_16 = arith.constant 0 : index
    %c0_17 = arith.constant 0 : index
    %18 = vector.load %arg7[%c0_16, %c0_17] : memref<32x16xf32, #tpu.memory_space<vmem>>, vector<32x16xf32>
    %cst_18 = arith.constant dense<0.000000e+00> : vector<8x16xf32>
    %19 = tpu.matmul %11, %18, %cst_18 {dimension_numbers = #tpu.dot_dimension_numbers<[1], [0], [0], [1], [0, 0, 1, 1], [], []>} : vector<8x32xf32>, vector<32x16xf32>, vector<8x16xf32> -> vector<8x16xf32>
    %c0_19 = arith.constant 0 : index
    %c0_20 = arith.constant 0 : index
    %20 = vector.load %arg9[%c0_19, %c0_20] : memref<1x16xf32, #tpu.memory_space<vmem>>, vector<1x16xf32>
    %21 = vector.broadcast %20 : vector<1x16xf32> to vector<8x16xf32>
    %22 = arith.addf %19, %21 : vector<8x16xf32>
    %c0_21 = arith.constant 0 : index
    %c0_22 = arith.constant 0 : index
    %23 = vector.load %arg1[%c0_21, %c0_22] : memref<8x16xf32, #tpu.memory_space<vmem>>, vector<8x16xf32>
    %24 = math.exp %17 : vector<8x16xf32>
    %25 = arith.mulf %23, %24 : vector<8x16xf32>
    %26 = arith.addf %25, %22 : vector<8x16xf32>
    %c0_23 = arith.constant 0 : index
    %c0_24 = arith.constant 0 : index
    %27 = vector.load %arg10[%c0_23, %c0_24] : memref<8x16xf32, #tpu.memory_space<vmem>>, vector<8x16xf32>
    tpu.vector_store %arg10[%c0_23, %c0_24], %26 {strides = array<i32>} : memref<8x16xf32, #tpu.memory_space<vmem>>, vector<8x16xf32>,
    %cst_25 = arith.constant 1.000000e+00 : f32
    %28 = vector.broadcast %cst_25 : f32 to vector<1x16xf32>
    %cst_26 = arith.constant dense<0.000000e+00> : vector<1x8xf32>
    %29 = tpu.matmul %28, %17, %cst_26 {dimension_numbers = #tpu.dot_dimension_numbers<[1], [1], [0], [0], [0, 0, 1, 0], [], []>} : vector<1x16xf32>, vector<8x16xf32>, vector<1x8xf32> -> vector<1x8xf32>
    %c0_27 = arith.constant 0 : index
    %c0_28 = arith.constant 0 : index
    %30 = vector.load %arg11[%c0_27, %c0_28] : memref<1x8xf32, #tpu.memory_space<vmem>>, vector<1x8xf32>
    tpu.vector_store %arg11[%c0_27, %c0_28], %29 {strides = array<i32>} : memref<1x8xf32, #tpu.memory_space<vmem>>, vector<1x8xf32>,
    return
  }
  func.func @transform_0(%arg0: i32) -> (i32, i32) {
    %c0_i32 = arith.constant 0 : i32
    %c0_i32_0 = arith.constant 0 : i32
    return %arg0, %c0_i32 : i32, i32
  }
  func.func @transform_1(%arg0: i32) -> (i32, i32) {
    %c0_i32 = arith.constant 0 : i32
    %c0_i32_0 = arith.constant 0 : i32
    return %arg0, %c0_i32 : i32, i32
  }
  func.func @transform_2(%arg0: i32) -> (i32, i32) {
    %c0_i32 = arith.constant 0 : i32
    %c0_i32_0 = arith.constant 0 : i32
    %c0_i32_1 = arith.constant 0 : i32
    return %c0_i32, %c0_i32_0 : i32, i32
  }
  func.func @transform_3(%arg0: i32) -> (i32, i32) {
    %c0_i32 = arith.constant 0 : i32
    %c0_i32_0 = arith.constant 0 : i32
    %c0_i32_1 = arith.constant 0 : i32
    return %c0_i32, %c0_i32_0 : i32, i32
  }
  func.func @transform_4(%arg0: i32) -> (i32, i32) {
    %c0_i32 = arith.constant 0 : i32
    %c0_i32_0 = arith.constant 0 : i32
    %c0_i32_1 = arith.constant 0 : i32
    return %c0_i32, %c0_i32_0 : i32, i32
  }
  func.func @transform_5(%arg0: i32) -> (i32, i32) {
    %c0_i32 = arith.constant 0 : i32
    %c0_i32_0 = arith.constant 0 : i32
    %c0_i32_1 = arith.constant 0 : i32
    return %c0_i32, %c0_i32_0 : i32, i32
  }
  func.func @transform_6(%arg0: i32) -> (i32, i32) {
    %c0_i32 = arith.constant 0 : i32
    %c0_i32_0 = arith.constant 0 : i32
    %c0_i32_1 = arith.constant 0 : i32
    return %c0_i32, %c0_i32_0 : i32, i32
  }
  func.func @transform_7(%arg0: i32) -> (i32, i32) {
    %c0_i32 = arith.constant 0 : i32
    %c0_i32_0 = arith.constant 0 : i32
    %c0_i32_1 = arith.constant 0 : i32
    return %c0_i32, %c0_i32_0 : i32, i32
  }
  func.func @transform_8(%arg0: i32) -> (i32, i32) {
    %c0_i32 = arith.constant 0 : i32
    %c0_i32_0 = arith.constant 0 : i32
    %c0_i32_1 = arith.constant 0 : i32
    return %c0_i32, %c0_i32_0 : i32, i32
  }
  func.func @transform_9(%arg0: i32) -> (i32, i32) {
    %c0_i32 = arith.constant 0 : i32
    %c0_i32_0 = arith.constant 0 : i32
    return %arg0, %c0_i32 : i32, i32
  }
  func.func @transform_10(%arg0: i32) -> (i32, i32) {
    %c0_i32 = arith.constant 0 : i32
    %c0_i32_0 = arith.constant 0 : i32
    return %c0_i32, %arg0 : i32, i32
  }
}

</mosaic_0001>

<bundles_post_ra>
// kernel: tpu_custom_call.1
= control target key start
LH: loop header
LB: loop body
LE: loop exit
PB: predicated region body
PF: predicated region fallthrough
CT: control target
= control target key end

     0   :  { %16 = vsyncpa [#allocation3], 0  ;;  %vm41_vm0 = vcmask 64512   ;;  %vm65_vm1 = vcmask 130048   ;;  %s405_s0 = inlined_call_operand.vmem [shape: f32[8,16], index: 0, kind: input, shape index: {}]   ;;  %s406_s1 = inlined_call_operand.vmem [shape: f32[8,8], index: 1, kind: input, shape index: {}]   ;;  %s407_s2 = inlined_call_operand.vmem [shape: f32[16,32], index: 2, kind: input, shape index: {}]   ;;  %s408_s3 = inlined_call_operand.vmem [shape: f32[8,32], index: 3, kind: input, shape index: {}]   ;;  %s409_s4 = inlined_call_operand.vmem [shape: f32[1,32], index: 4, kind: input, shape index: {}]   ;;  %s410_s5 = inlined_call_operand.vmem [shape: f32[32,16], index: 5, kind: input, shape index: {}]   ;;  %s411_s6 = inlined_call_operand.vmem [shape: f32[32,16], index: 6, kind: input, shape index: {}]   ;;  %s412_s7 = inlined_call_operand.vmem [shape: f32[1,16], index: 7, kind: input, shape index: {}]   ;;  %s413_s8 = inlined_call_operand.vmem [shape: f32[1,16], index: 8, kind: input, shape index: {}]   ;;  %s414_s9 = inlined_call_operand.hbm [shape: f32[8,16], index: 9, kind: output, shape index: {0}]   ;;  %s415_s10 = inlined_call_operand.hbm [shape: f32[1,8], index: 10, kind: output, shape index: {1}]  }
   0x1   :  { %v38_v0 = vld [vmem:[%s407_s2 + $0x8] sm:$0xff]  ;;  %v40_v1 = vld [vmem:[%s408_s3] sm:$0xff] }
   0x2   :  { %v37_v2 = vld [vmem:[%s407_s2] sm:$0xff]  ;;  %83 = vmatpush.msra.mxu1 %v38_v0  ;;  %60 = vmatpush.msra.mxu0 %v40_v1 }
   0x3   :  { %v39_v3 = vld [vmem:[%s406_s1] sm:$0xff] }
   0x4   :  { %v36_v4 = vld [vmem:[%s405_s0] sm:$0xff]  ;;  %221 = vmatmul.msk.f32.vlgmr.msra.gmra.mxu0 %vm41_vm0, %v39_v3 }
   0x5   :  { %17 = vsyncpa [#allocation5], 0  ;;  %84 = vmatpush.msra.mxu1 %v37_v2  ;;  %v98_v5 = vld [vmem:[%s410_s5 + $0x18] sm:$0xff]  ;;  %v97_v7 = vld [vmem:[%s410_s5 + $0x10] sm:$0xff]  ;;  %vm103_vm2 = vcmask 261120   ;;  %v289_v24 = vmov 1.0  }
   0x6   :  { %222 = vmatmul.msk.f32.vlgmr.msra.gmra.mxu1 %vm65_vm1, %v36_v4  ;;  %v131_v6 = vld [vmem:[%s411_s6 + $0x18] sm:$0xff]  ;;  %119 = vmatpush.msra.mxu2 %v98_v5  ;;  %v130_v8 = vld [vmem:[%s411_s6 + $0x10] sm:$0xff]  ;;  %v96_v9 = vld [vmem:[%s410_s5 + $0x8] sm:$0xff]  ;;  %s290_s18 = smov [#allocation2]   ;;  %s196_s21 = sshll.u32 %s414_s9, 4  ;;  %vm187_vm3 = vcmask 57344   ;;  %s197_s21 = int_to_ptr.hbm [resolvable:$true] %s196_s21 }
   0x7   :  { %148 = vmatpush.msra.mxu3 %v131_v6  ;;  %v129_v10 = vld [vmem:[%s411_s6 + $0x8] sm:$0xff]  ;;  %v95_v11 = vld [vmem:[%s410_s5] sm:$0xff]  ;;  %s194_s19 = sshll.u32 %s290_s18, 4  ;;  %s291_s22 = smov [#allocation4]   ;;  %s195_s19 = int_to_ptr.vmem [resolvable:$true] %s194_s19 }
   0x8   :  { %120 = vmatpush.msra.mxu2 %v97_v7  ;;  %v128_v12 = vld [vmem:[%s411_s6] sm:$0xff]  ;;  %s205_s3 = sshll.u32 %s291_s22, 4  ;;  %s207_s2 = sshll.u32 %s415_s10, 4  ;;  %s206_s3 = int_to_ptr.vmem [resolvable:$true] %s205_s3  ;;  %s208_s2 = int_to_ptr.hbm [resolvable:$true] %s207_s2 }
   0x9   :  { %149 = vmatpush.msra.mxu3 %v130_v8  ;;  %v230_v14 = vld [vmem:[%s409_s4] ss:$0 sm:$0xff] }
   0xa   :  { %121 = vmatpush.msra.mxu2 %v96_v9  ;;  %v231_v19 = vld [vmem:[%s412_s7] ss:$0 sm:$0xff] }
   0xb   :  { %150 = vmatpush.msra.mxu3 %v129_v10  ;;  %v232_v25 = vld [vmem:[%s413_s8] ss:$0 sm:$0xff] }
   0xc   :  { %122 = vmatpush.msra.mxu2 %v95_v11 }
   0xd   :  { %151 = vmatpush.msra.mxu3 %v128_v12 }
  0x81   :  { %v62_v13 = vpop.f32.mrf.mxu0 }
  0x83   :  { %v86_v15 = vpop.f32.mrf.mxu1 }
  0x84   :  { %v87_v16 = vadd.f32 %v86_v15, %v62_v13 }
  0x86   :  { %v93_v17 = vadd.f32 %v230_v14, %v87_v16 }
  0x88   :  { %v94_v18 = vmax.f32 %v93_v17, 0.0 }
  0x8a   :  { %223 = vmatmul.msk.f32.vlgmr.msra.gmra.mxu2 %vm103_vm2, %v94_v18  ;;  %224 = vmatmul.msk.f32.vlgmr.msra.gmra.mxu3 %vm103_vm2, %v94_v18 }
 0x10d   :  { %v124_v20 = vpop.f32.mrf.mxu2  ;;  %v153_v26 = vpop.f32.mrf.mxu3 }
 0x10e   :  { %v125_v21 = vadd.f32 %v231_v19, %v124_v20  ;;  %v154_v28 = vadd.f32 %v232_v25, %v153_v26 }
 0x110   :  { %233 = vtanh.f32 %v125_v21 }
 0x116   :  { %v234_v22 = vpop.eup %233 }
 0x117   :  { %v156_v23 = vmul.f32 1.442695, %v234_v22  ;;  %225 = vmatpush.xpose.msk.msrb.mxu0 %vm65_vm1, %v234_v22 }
 0x119   :  { %235 = vpow2.f32 %v156_v23 }
 0x11a   :  { %226 = vmatmul.msk.f32.vlgmr.msrb.gmra.mxu0 %vm65_vm1, %v289_v24 }
 0x11f   :  { %v236_v27 = vpop.eup %235 }
 0x120   :  { %v158_v29 = vmul.f32 %v236_v27, %v36_v4 }
 0x122   :  { %v159_v30 = vadd.f32 %v158_v29, %v154_v28 }
 0x124   :  { %160 = vst.msk [vmem:[#allocation2] sm:$0xff] %vm65_vm1, %v159_v30 }
 0x125   :  { %199 = dma.vmem_to_hbm [thread:$0]  %s195_s19, 128, %s197_s21, [#allocation3]  }
 0x197   :  { %v184_v31 = vpop.f32.mrf.mxu0 }
 0x198   :  { %188 = vst.msk [vmem:[#allocation4] sm:$0x1] %vm187_vm3, %v184_v31 }
 0x199   :  { %210 = dma.vmem_to_hbm [thread:$0]  %s206_s3, 16, %s208_s2, [#allocation5]  }
 0x19a   :  { %285 = dma.done.wait [#allocation3], 128  }
 0x19b   :  { %286 = vsyncadd [#allocation3], 4294967168 }
 0x19c   :  { %287 = dma.done.wait [#allocation5], 16  }
 0x19d   :  { %288 = vsyncadd [#allocation5], 4294967280 }
 0x19e   :  { %219 = vsyncpa [#allocation3], 1 }
 0x19f   :  { %220 = vsyncpa [#allocation5], 1 }

</bundles_post_ra>
